<compile_context>
chip_gen: v7x
topology: tpu7x:2x2x1
jax: 0.10.0
libtpu: 0.0.40
codegen_flags: <defaults>
</compile_context>

<pallas_src>
import jax
import jax.numpy as jnp
from jax.experimental import pallas as pl
from jax.experimental.pallas import tpu as pltpu

ACTIONS = 9
POLICY_FEATURE_SIZE = 16
VALUE_FEATURE_SIZE = 16
TRANSFORMER_FEATURE_SIZE = 64

FEAT = TRANSFORMER_FEATURE_SIZE                              # 64
H1 = POLICY_FEATURE_SIZE * 2 + VALUE_FEATURE_SIZE * 2        # 64  (32 policy | 32 value)
H2 = POLICY_FEATURE_SIZE + VALUE_FEATURE_SIZE                # 32  (16 policy | 16 value)
OUT_LANES = 16                                               # 9 policy + 1 value + 6 pad
VALUE_LANE = ACTIONS                                         # lane index 9


def _round_up(x, m):
    return ((x + m - 1) // m) * m


# ----------------------------------------------------------------------------
# Kernel: one batch tile [TB, 64] -> one output slab [TB, 16]
# ----------------------------------------------------------------------------
def _fused_extractor_kernel(x_ref, legal_ref,
                            w1_ref, b1_ref, w2_ref, b2_ref, w3_ref, b3_ref,
                            out_ref):
    x = x_ref[...]                                                            # [TB, 64]

    h = jnp.dot(x, w1_ref[...], preferred_element_type=jnp.float32) + b1_ref[...]
    h = jnp.maximum(h, 0.0)                                                   # [TB, 64]
    h = jnp.dot(h, w2_ref[...], preferred_element_type=jnp.float32) + b2_ref[...]
    h = jnp.maximum(h, 0.0)                                                   # [TB, 32]
    y = jnp.dot(h, w3_ref[...], preferred_element_type=jnp.float32) + b3_ref[...]  # [TB, 16]

    # legal_ref holds legal_actions in lanes 0..8 and constant 1.0 in lanes 9..15,
    # so the additive mask is exactly 0 on the value/pad lanes.
    y = y + (1.0 - legal_ref[...]) * -100000000.0

    # tanh only on the value lane (EUP op; policy lanes pass through).
    lane = jax.lax.broadcasted_iota(jnp.int32, y.shape, 1)
    out_ref[...] = jnp.where(lane == VALUE_LANE, jnp.tanh(y), y)


# ----------------------------------------------------------------------------
# Wrapper
# ----------------------------------------------------------------------------
def custom_mlp_extractor(features, legal_actions, fused_params, *, block_b=1024):
    """features: [B, 64] f32, legal_actions: [B, 9] f32 (0/1).
    fused_params: dict from fuse_params() (pre-concatenated / block-diag weights).
    Returns (policy_logits [B, 9], value [B, 1])."""
    B = features.shape[0]
    features = features.astype(jnp.float32)
    legal_actions = legal_actions.astype(jnp.float32)

    # Batch tile: multiple of 8 (f32 sublane), capped by block_b. Tiny B -> one step.
    tb = min(block_b, _round_up(B, 8))
    bp = _round_up(B, tb)

    if bp != B:
        features = jnp.pad(features, ((0, bp - B), (0, 0)))
        legal_actions = jnp.pad(legal_actions, ((0, bp - B), (0, 0)))
    # Lane-pad the mask input to the merged output width with 1.0 (mask contribution 0).
    legal16 = jnp.pad(legal_actions, ((0, 0), (0, OUT_LANES - ACTIONS)),
                      constant_values=1.0)

    p = fused_params
    grid = (bp // tb,)

    out = pl.pallas_call(
        _fused_extractor_kernel,
        out_shape=jax.ShapeDtypeStruct((bp, OUT_LANES), jnp.float32),
        grid_spec=pltpu.PrefetchScalarGridSpec(
            num_scalar_prefetch=0,
            grid=grid,
            in_specs=[
                # Streamed (tiled along batch, auto double-buffered):
                pl.BlockSpec((tb, FEAT), lambda i: (i, 0)),
                pl.BlockSpec((tb, OUT_LANES), lambda i: (i, 0)),
                # Resident weights/biases (constant block index -> DMAed once):
                pl.BlockSpec((FEAT, H1), lambda i: (0, 0)),
                pl.BlockSpec((1, H1), lambda i: (0, 0)),
                pl.BlockSpec((H1, H2), lambda i: (0, 0)),
                pl.BlockSpec((1, H2), lambda i: (0, 0)),
                pl.BlockSpec((H2, OUT_LANES), lambda i: (0, 0)),
                pl.BlockSpec((1, OUT_LANES), lambda i: (0, 0)),
            ],
            out_specs=pl.BlockSpec((tb, OUT_LANES), lambda i: (i, 0)),
        ),
        compiler_params=pltpu.CompilerParams(
            dimension_semantics=("parallel",),       # batch steps independent (v7x 2 TCs)
            vmem_limit_bytes=32 * 1024 * 1024,       # explicit, safe on v7x's 64 MiB VMEM
        ),
    )(features, legal16, p["w1"], p["b1"], p["w2"], p["b2"], p["w3"], p["b3"])

    policy = out[:B, :ACTIONS]
    value = out[:B, VALUE_LANE:VALUE_LANE + 1]
    return policy, value


# ----------------------------------------------------------------------------
# Parameter construction (PyTorch-Linear-like init) and head fusion
# ----------------------------------------------------------------------------
def _init_linear(key, in_dim, out_dim):
    """Returns W^T ([in, out]) and b ([1, out])."""
    kw, kb = jax.random.split(key)
    bound = 1.0 / jnp.sqrt(jnp.float32(in_dim))
    w = jax.random.uniform(kw, (out_dim, in_dim), jnp.float32, -bound, bound)
    b = jax.random.uniform(kb, (out_dim,), jnp.float32, -bound, bound)
    return w.T, b.reshape(1, out_dim)


def make_params(seed=42):
    keys = jax.random.split(jax.random.PRNGKey(seed), 6)
    pw1, pb1 = _init_linear(keys[0], TRANSFORMER_FEATURE_SIZE, POLICY_FEATURE_SIZE * 2)
    pw2, pb2 = _init_linear(keys[1], POLICY_FEATURE_SIZE * 2, POLICY_FEATURE_SIZE)
    pw3, pb3 = _init_linear(keys[2], POLICY_FEATURE_SIZE, ACTIONS)
    vw1, vb1 = _init_linear(keys[3], TRANSFORMER_FEATURE_SIZE, VALUE_FEATURE_SIZE * 2)
    vw2, vb2 = _init_linear(keys[4], VALUE_FEATURE_SIZE * 2, VALUE_FEATURE_SIZE)
    vw3, vb3 = _init_linear(keys[5], VALUE_FEATURE_SIZE, 1)
    return dict(pw1=pw1, pb1=pb1, pw2=pw2, pb2=pb2, pw3=pw3, pb3=pb3,
                vw1=vw1, vb1=vb1, vw2=vw2, vb2=vb2, vw3=vw3, vb3=vb3)


def fuse_params(p):
    """Pack the two heads into 3 wide (block-diagonal) layers. Done once in plain JAX."""
    ph1, vh1 = POLICY_FEATURE_SIZE * 2, VALUE_FEATURE_SIZE * 2      # 32, 32
    ph2, vh2 = POLICY_FEATURE_SIZE, VALUE_FEATURE_SIZE              # 16, 16

    w1 = jnp.concatenate([p["pw1"], p["vw1"]], axis=1)              # [64, 64]
    b1 = jnp.concatenate([p["pb1"], p["vb1"]], axis=1)              # [1, 64]

    w2 = jnp.zeros((H1, H2), jnp.float32)                           # [64, 32] block-diag
    w2 = w2.at[:ph1, :ph2].set(p["pw2"]).at[ph1:, ph2:].set(p["vw2"])
    b2 = jnp.concatenate([p["pb2"], p["vb2"]], axis=1)              # [1, 32]

    w3 = jnp.zeros((H2, OUT_LANES), jnp.float32)                    # [32, 16]
    w3 = w3.at[:ph2, :ACTIONS].set(p["pw3"])                        # policy -> lanes 0..8
    w3 = w3.at[ph2:, VALUE_LANE:VALUE_LANE + 1].set(p["vw3"])       # value  -> lane 9
    b3 = jnp.zeros((1, OUT_LANES), jnp.float32)
    b3 = b3.at[:, :ACTIONS].set(p["pb3"])
    b3 = b3.at[:, VALUE_LANE:VALUE_LANE + 1].set(p["vb3"])

    return dict(w1=w1, b1=b1, w2=w2, b2=b2, w3=w3, b3=b3)


# ----------------------------------------------------------------------------
# Pure-JAX reference (un-fused, per-head — the original module's math)
# ----------------------------------------------------------------------------
def _reference(features, legal_actions, p):
    h = jnp.maximum(features @ p["pw1"] + p["pb1"], 0.0)
    h = jnp.maximum(h @ p["pw2"] + p["pb2"], 0.0)
    pol = h @ p["pw3"] + p["pb3"] + (1.0 - legal_actions) * -100000000.0
    v = jnp.maximum(features @ p["vw1"] + p["vb1"], 0.0)
    v = jnp.maximum(v @ p["vw2"] + p["vb2"], 0.0)
    val = jnp.tanh(v @ p["vw3"] + p["vb3"])
    return pol, val


if __name__ == "__main__":
    params = make_params(seed=42)
    fused = fuse_params(params)

    # Small inference-sized batch (collapses to a single grid step).
    B = 2
    kf, kl = jax.random.split(jax.random.PRNGKey(0))
    features = jax.random.normal(kf, (B, TRANSFORMER_FEATURE_SIZE), jnp.float32)
    legal_actions = (jax.random.uniform(kl, (B, ACTIONS)) > 0.5).astype(jnp.float32)

    policy, value = custom_mlp_extractor(features, legal_actions, fused)
    policy = jax.block_until_ready(policy)
    value = jax.block_until_ready(value)

    ref_policy, ref_value = _reference(features, legal_actions, params)
    assert policy.shape == (B, ACTIONS) and value.shape == (B, 1)
    assert jnp.allclose(policy, ref_policy, atol=1e-2, rtol=1e-5)
    assert jnp.allclose(value, ref_value, atol=1e-4, rtol=1e-4)

    # Exercise the multi-tile path (grid > 1, batch padding).
    B2 = 200
    kf2, kl2 = jax.random.split(jax.random.PRNGKey(1))
    feats2 = jax.random.normal(kf2, (B2, TRANSFORMER_FEATURE_SIZE), jnp.float32)
    legal2 = (jax.random.uniform(kl2, (B2, ACTIONS)) > 0.5).astype(jnp.float32)
    pol2, val2 = custom_mlp_extractor(feats2, legal2, fused, block_b=64)
    pol2 = jax.block_until_ready(pol2)
    val2 = jax.block_until_ready(val2)
    ref_pol2, ref_val2 = _reference(feats2, legal2, params)
    assert pol2.shape == (B2, ACTIONS) and val2.shape == (B2, 1)
    assert jnp.allclose(pol2, ref_pol2, atol=1e-2, rtol=1e-5)
    assert jnp.allclose(val2, ref_val2, atol=1e-4, rtol=1e-4)

    print("KERNEL_OK")
</pallas_src>

<mosaic_0001>
module attributes {stable_mosaic.version = 11 : i64} {
  func.func @_fused_extractor_kernel(%arg0: i32, %arg1: memref<8x64xf32, #tpu.memory_space<vmem>>, %arg2: memref<8x16xf32, #tpu.memory_space<vmem>>, %arg3: memref<64x64xf32, #tpu.memory_space<vmem>>, %arg4: memref<1x64xf32, #tpu.memory_space<vmem>>, %arg5: memref<64x32xf32, #tpu.memory_space<vmem>>, %arg6: memref<1x32xf32, #tpu.memory_space<vmem>>, %arg7: memref<32x16xf32, #tpu.memory_space<vmem>>, %arg8: memref<1x16xf32, #tpu.memory_space<vmem>>, %arg9: memref<8x16xf32, #tpu.memory_space<vmem>>) attributes {dimension_semantics = [#tpu.dimension_semantics<parallel>], iteration_bounds = array<i64: 1>, scalar_prefetch = 0 : i64, scratch_operands = 0 : i64, tpu.core_type = #tpu.core_type<tc>, window_params = [{transform_indices = @transform_0, window_bounds = array<i64: 8, 64>}, {transform_indices = @transform_1, window_bounds = array<i64: 8, 16>}, {pipeline_mode = #tpu.pipeline_mode<synchronous>, transform_indices = @transform_2, window_bounds = array<i64: 64, 64>}, {pipeline_mode = #tpu.pipeline_mode<synchronous>, transform_indices = @transform_3, window_bounds = array<i64: 1, 64>}, {pipeline_mode = #tpu.pipeline_mode<synchronous>, transform_indices = @transform_4, window_bounds = array<i64: 64, 32>}, {pipeline_mode = #tpu.pipeline_mode<synchronous>, transform_indices = @transform_5, window_bounds = array<i64: 1, 32>}, {pipeline_mode = #tpu.pipeline_mode<synchronous>, transform_indices = @transform_6, window_bounds = array<i64: 32, 16>}, {pipeline_mode = #tpu.pipeline_mode<synchronous>, transform_indices = @transform_7, window_bounds = array<i64: 1, 16>}, {transform_indices = @transform_8, window_bounds = array<i64: 8, 16>}]} {
    %c0 = arith.constant 0 : index
    %c0_0 = arith.constant 0 : index
    %0 = vector.load %arg1[%c0, %c0_0] : memref<8x64xf32, #tpu.memory_space<vmem>>, vector<8x64xf32>
    %c0_1 = arith.constant 0 : index
    %c0_2 = arith.constant 0 : index
    %1 = vector.load %arg3[%c0_1, %c0_2] : memref<64x64xf32, #tpu.memory_space<vmem>>, vector<64x64xf32>
    %cst = arith.constant dense<0.000000e+00> : vector<8x64xf32>
    %2 = tpu.matmul %0, %1, %cst {dimension_numbers = #tpu.dot_dimension_numbers<[1], [0], [0], [1], [0, 0, 1, 1], [], []>} : vector<8x64xf32>, vector<64x64xf32>, vector<8x64xf32> -> vector<8x64xf32>
    %c0_3 = arith.constant 0 : index
    %c0_4 = arith.constant 0 : index
    %3 = vector.load %arg4[%c0_3, %c0_4] : memref<1x64xf32, #tpu.memory_space<vmem>>, vector<1x64xf32>
    %4 = vector.broadcast %3 : vector<1x64xf32> to vector<8x64xf32>
    %5 = arith.addf %2, %4 : vector<8x64xf32>
    %cst_5 = arith.constant 0.000000e+00 : f32
    %6 = vector.broadcast %cst_5 : f32 to vector<8x64xf32>
    %7 = arith.maximumf %5, %6 : vector<8x64xf32>
    %c0_6 = arith.constant 0 : index
    %c0_7 = arith.constant 0 : index
    %8 = vector.load %arg5[%c0_6, %c0_7] : memref<64x32xf32, #tpu.memory_space<vmem>>, vector<64x32xf32>
    %cst_8 = arith.constant dense<0.000000e+00> : vector<8x32xf32>
    %9 = tpu.matmul %7, %8, %cst_8 {dimension_numbers = #tpu.dot_dimension_numbers<[1], [0], [0], [1], [0, 0, 1, 1], [], []>} : vector<8x64xf32>, vector<64x32xf32>, vector<8x32xf32> -> vector<8x32xf32>
    %c0_9 = arith.constant 0 : index
    %c0_10 = arith.constant 0 : index
    %10 = vector.load %arg6[%c0_9, %c0_10] : memref<1x32xf32, #tpu.memory_space<vmem>>, vector<1x32xf32>
    %11 = vector.broadcast %10 : vector<1x32xf32> to vector<8x32xf32>
    %12 = arith.addf %9, %11 : vector<8x32xf32>
    %cst_11 = arith.constant 0.000000e+00 : f32
    %13 = vector.broadcast %cst_11 : f32 to vector<8x32xf32>
    %14 = arith.maximumf %12, %13 : vector<8x32xf32>
    %c0_12 = arith.constant 0 : index
    %c0_13 = arith.constant 0 : index
    %15 = vector.load %arg7[%c0_12, %c0_13] : memref<32x16xf32, #tpu.memory_space<vmem>>, vector<32x16xf32>
    %cst_14 = arith.constant dense<0.000000e+00> : vector<8x16xf32>
    %16 = tpu.matmul %14, %15, %cst_14 {dimension_numbers = #tpu.dot_dimension_numbers<[1], [0], [0], [1], [0, 0, 1, 1], [], []>} : vector<8x32xf32>, vector<32x16xf32>, vector<8x16xf32> -> vector<8x16xf32>
    %c0_15 = arith.constant 0 : index
    %c0_16 = arith.constant 0 : index
    %17 = vector.load %arg8[%c0_15, %c0_16] : memref<1x16xf32, #tpu.memory_space<vmem>>, vector<1x16xf32>
    %18 = vector.broadcast %17 : vector<1x16xf32> to vector<8x16xf32>
    %19 = arith.addf %16, %18 : vector<8x16xf32>
    %c0_17 = arith.constant 0 : index
    %c0_18 = arith.constant 0 : index
    %20 = vector.load %arg2[%c0_17, %c0_18] : memref<8x16xf32, #tpu.memory_space<vmem>>, vector<8x16xf32>
    %cst_19 = arith.constant 1.000000e+00 : f32
    %21 = vector.broadcast %cst_19 : f32 to vector<8x16xf32>
    %22 = arith.subf %21, %20 : vector<8x16xf32>
    %cst_20 = arith.constant -1.000000e+08 : f32
    %23 = vector.broadcast %cst_20 : f32 to vector<8x16xf32>
    %24 = arith.mulf %22, %23 : vector<8x16xf32>
    %25 = arith.addf %19, %24 : vector<8x16xf32>
    %26 = tpu.iota {dimensions = array<i32: 1>} : vector<8x16xi32>
    %c9_i32 = arith.constant 9 : i32
    %27 = vector.broadcast %c9_i32 : i32 to vector<8x16xi32>
    %28 = arith.cmpi eq, %26, %27 : vector<8x16xi32>
    %29 = math.tanh %25 : vector<8x16xf32>
    %30 = arith.select %28, %29, %25 : vector<8x16xi1>, vector<8x16xf32>
    %c0_21 = arith.constant 0 : index
    %c0_22 = arith.constant 0 : index
    %31 = vector.load %arg9[%c0_21, %c0_22] : memref<8x16xf32, #tpu.memory_space<vmem>>, vector<8x16xf32>
    tpu.vector_store %arg9[%c0_21, %c0_22], %30 {strides = array<i32>} : memref<8x16xf32, #tpu.memory_space<vmem>>, vector<8x16xf32>,
    return
  }
  func.func @transform_0(%arg0: i32) -> (i32, i32) {
    %c0_i32 = arith.constant 0 : i32
    %c0_i32_0 = arith.constant 0 : i32
    return %arg0, %c0_i32 : i32, i32
  }
  func.func @transform_1(%arg0: i32) -> (i32, i32) {
    %c0_i32 = arith.constant 0 : i32
    %c0_i32_0 = arith.constant 0 : i32
    return %arg0, %c0_i32 : i32, i32
  }
  func.func @transform_2(%arg0: i32) -> (i32, i32) {
    %c0_i32 = arith.constant 0 : i32
    %c0_i32_0 = arith.constant 0 : i32
    %c0_i32_1 = arith.constant 0 : i32
    return %c0_i32, %c0_i32_0 : i32, i32
  }
  func.func @transform_3(%arg0: i32) -> (i32, i32) {
    %c0_i32 = arith.constant 0 : i32
    %c0_i32_0 = arith.constant 0 : i32
    %c0_i32_1 = arith.constant 0 : i32
    return %c0_i32, %c0_i32_0 : i32, i32
  }
  func.func @transform_4(%arg0: i32) -> (i32, i32) {
    %c0_i32 = arith.constant 0 : i32
    %c0_i32_0 = arith.constant 0 : i32
    %c0_i32_1 = arith.constant 0 : i32
    return %c0_i32, %c0_i32_0 : i32, i32
  }
  func.func @transform_5(%arg0: i32) -> (i32, i32) {
    %c0_i32 = arith.constant 0 : i32
    %c0_i32_0 = arith.constant 0 : i32
    %c0_i32_1 = arith.constant 0 : i32
    return %c0_i32, %c0_i32_0 : i32, i32
  }
  func.func @transform_6(%arg0: i32) -> (i32, i32) {
    %c0_i32 = arith.constant 0 : i32
    %c0_i32_0 = arith.constant 0 : i32
    %c0_i32_1 = arith.constant 0 : i32
    return %c0_i32, %c0_i32_0 : i32, i32
  }
  func.func @transform_7(%arg0: i32) -> (i32, i32) {
    %c0_i32 = arith.constant 0 : i32
    %c0_i32_0 = arith.constant 0 : i32
    %c0_i32_1 = arith.constant 0 : i32
    return %c0_i32, %c0_i32_0 : i32, i32
  }
  func.func @transform_8(%arg0: i32) -> (i32, i32) {
    %c0_i32 = arith.constant 0 : i32
    %c0_i32_0 = arith.constant 0 : i32
    return %arg0, %c0_i32 : i32, i32
  }
}

</mosaic_0001>

<bundles_post_ra>
// kernel: tpu_custom_call.1
= control target key start
LH: loop header
LB: loop body
LE: loop exit
PB: predicated region body
PF: predicated region fallthrough
CT: control target
= control target key end

     0   :  { %v458_v3 = vmov 0.0|0.0   ;;  %vm459_vm0 = vmmov 0   ;;  %v460_v6 = vmov 0.0   ;;  %s599_s0 = inlined_call_operand.vmem [shape: f32[8,64], index: 0, kind: input, shape index: {}]   ;;  %s600_s1 = inlined_call_operand.vmem [shape: f32[8,16], index: 1, kind: input, shape index: {}]   ;;  %s601_s2 = inlined_call_operand.vmem [shape: f32[64,64], index: 2, kind: input, shape index: {}]   ;;  %s602_s3 = inlined_call_operand.vmem [shape: f32[1,64], index: 3, kind: input, shape index: {}]   ;;  %s603_s4 = inlined_call_operand.vmem [shape: f32[64,32], index: 4, kind: input, shape index: {}]   ;;  %s604_s5 = inlined_call_operand.vmem [shape: f32[1,32], index: 5, kind: input, shape index: {}]   ;;  %s605_s6 = inlined_call_operand.vmem [shape: f32[32,16], index: 6, kind: input, shape index: {}]   ;;  %s606_s7 = inlined_call_operand.vmem [shape: f32[1,16], index: 7, kind: input, shape index: {}]   ;;  %s607_s8 = inlined_call_operand.hbm [shape: f32[8,16], index: 8, kind: output, shape index: {}]  }
   0x1   :  { %v31_v0 = vld [vmem:[%s601_s2] sm:$0xff]  ;;  %v32_v1 = vld [vmem:[%s601_s2 + $0x8] sm:$0xff]  ;;  %v33_v2 = vld [vmem:[%s601_s2 + $0x10] sm:$0xff]  ;;  %398 = vmatprep.subr.bf16.mxu0 %v458_v3  ;;  %365 = vmatprep.mubr.msk.f32.mxu0 %vm459_vm0, %v460_v6 }
   0x2   :  { %v399_v4 = vpack.c.bf16 %v32_v1, %v31_v0  ;;  %v34_v5 = vld [vmem:[%s601_s2 + $0x18] sm:$0xff]  ;;  %410 = vmatprep.subr.bf16.mxu1 %v458_v3  ;;  %384 = vmatprep.mubr.msk.f32.mxu1 %vm459_vm0, %v460_v6  ;;  %v121_v8 = vld [vmem:[%s603_s4] sm:$0xff]  ;;  %v122_v9 = vld [vmem:[%s603_s4 + $0x8] sm:$0xff] }
   0x3   :  { %v402_v7 = vpack.c.bf16 %v34_v5, %v33_v2  ;;  %v123_v10 = vld [vmem:[%s603_s4 + $0x10] sm:$0xff]  ;;  %v35_v11 = vld [vmem:[%s601_s2 + $0x20] sm:$0xff]  ;;  %v36_v12 = vld [vmem:[%s601_s2 + $0x28] sm:$0xff]  ;;  %v411_v13 = vpack.c.bf16 %v122_v9, %v121_v8 }
   0x4   :  { %400 = vmatpush3.bf16.msra.mxu0 %v399_v4  ;;  %v124_v14 = vld [vmem:[%s603_s4 + $0x18] sm:$0xff] }
   0x5   :  { %401 = vmatprep.subr.bf16.mxu0 %v458_v3 }
   0x6   :  { %13 = vsyncpa [#allocation3], 0  ;;  %412 = vmatpush3.bf16.msra.mxu1 %v411_v13  ;;  %v414_v15 = vpack.c.bf16 %v124_v14, %v123_v10  ;;  %v405_v16 = vpack.c.bf16 %v36_v12, %v35_v11  ;;  %v125_v17 = vld [vmem:[%s603_s4 + $0x20] sm:$0xff]  ;;  %v126_v18 = vld [vmem:[%s603_s4 + $0x28] sm:$0xff]  ;;  %vm46_vm1 = vcmask 523264   ;;  %vm221_vm2 = vcmask 261120  }
   0x7   :  { %413 = vmatprep.subr.bf16.mxu1 %v458_v3  ;;  %v37_v19 = vld [vmem:[%s601_s2 + $0x30] sm:$0xff]  ;;  %v38_v20 = vld [vmem:[%s601_s2 + $0x38] sm:$0xff]  ;;  %v417_v21 = vpack.c.bf16 %v126_v18, %v125_v17  ;;  %v30_v23 = vld [vmem:[%s599_s0] sm:$0xff]  ;;  %v299_v51 = vlaneseq  ;;  %vm304_vm4 = vcmask 130048  }
   0x8   :  { %403 = vmatpush3.bf16.msra.mxu0 %v402_v7  ;;  %v408_v22 = vpack.c.bf16 %v38_v20, %v37_v19  ;;  %v127_v24 = vld [vmem:[%s603_s4 + $0x30] sm:$0xff]  ;;  %v128_v25 = vld [vmem:[%s603_s4 + $0x38] sm:$0xff]  ;;  %v210_v27 = vld [vmem:[%s605_s6] sm:$0xff] }
   0x9   :  { %404 = vmatprep.subr.bf16.mxu0 %v458_v3  ;;  %v420_v26 = vpack.c.bf16 %v128_v25, %v127_v24  ;;  %v211_v28 = vld [vmem:[%s605_s6 + $0x8] sm:$0xff]  ;;  %v320_v30 = vld [vmem:[%s602_s3] ss:$0 sm:$0xff]  ;;  %v212_v35 = vld [vmem:[%s605_s6 + $0x10] sm:$0xff]  ;;  %v300_v52 = vand.u32 127, %v299_v51 }
   0xa   :  { %415 = vmatpush3.bf16.msra.mxu1 %v414_v15  ;;  %v423_v29 = vpack.c.bf16 %v211_v28, %v210_v27  ;;  %v213_v36 = vld [vmem:[%s605_s6 + $0x18] sm:$0xff]  ;;  %v322_v38 = vld [vmem:[%s604_s5] ss:$0 sm:$0xff]  ;;  %s461_s5 = smov [#allocation2]  }
   0xb   :  { %416 = vmatprep.subr.bf16.mxu1 %v458_v3  ;;  %v426_v37 = vpack.c.bf16 %v213_v36, %v212_v35  ;;  %v295_v43 = vld [vmem:[%s600_s1] sm:$0xff]  ;;  %s312_s6 = sshll.u32 %s461_s5, 4  ;;  %vm301_vm3 = vcmp.eq.s32.totalorder %v300_v52, 9  ;;  %s313_s6 = int_to_ptr.vmem [resolvable:$true] %s312_s6 }
   0xc   :  { %406 = vmatpush3.bf16.msra.mxu0 %v405_v16  ;;  %v296_v44 = vsub.f32 1.0, %v295_v43  ;;  %v324_v45 = vld [vmem:[%s606_s7] ss:$0 sm:$0xff]  ;;  %s434_s1 = scalar_lea.vmem %s313_s6, 128  ;;  %p439_p1 = scmp.lt.s32.totalorder %s313_s6, %s313_s6 }
   0xd   :  { %407 = vmatprep.subr.bf16.mxu0 %v458_v3  ;;  %p435_p0 = scmp.ne.s32.totalorder %s313_s6, %s434_s1  ;;  %p440_p2 = scmp.lt.s32.totalorder %s434_s1, %s434_s1 }
   0xe   :  { %418 = vmatpush3.bf16.msra.mxu1 %v417_v21  ;;  %v297_v46 = vmul.f32 -1e+08, %v296_v44 }
   0xf   :  { %419 = vmatprep.subr.bf16.mxu1 %v458_v3  ;;  %p441_p3 = por %p440_p2, %p439_p1 }
  0x10   :  { %409 = vmatpush3.bf16.msra.mxu0 %v408_v22 }
  0x11   :  { %422 = vmatprep.subr.bf16.mxu0 %v458_v3  ;;  %p442_p4 = pnand %p441_p3, %p435_p0 }
  0x12   :  { %421 = vmatpush3.bf16.msra.mxu1 %v420_v26 }
  0x13   :  { %366 = vmatmul.mubr.msk.f32.vlgmr.msra.gmra.mrb[0].mxu0 %vm46_vm1, %v30_v23 }
  0x14   :  { %395 = vmatprep.mubr.msk.f32.mxu0 %vm459_vm0, %v460_v6  ;;  %424 = vmatpush3.bf16.msra.mxu0 %v423_v29 }
  0x15   :  { %425 = vmatprep.subr.bf16.mxu0 %v458_v3 }
  0x18   :  { %427 = vmatpush3.bf16.msra.mxu0 %v426_v37 }
  0xe6   :  { %v116_v31 = vpop.f32.mrb[0].mxu0 }
  0xe7   :  { %v117_v32 = vadd.f32 %v320_v30, %v116_v31  ;;  %v367_v33 = vpop.f32.mrb[1].mxu0 }
  0xe9   :  { %v120_v34 = vmax.f32 %v117_v32, 0.0 }
  0xeb   :  { %385 = vmatmul.mubr.msk.f32.vlgmr.msra.gmra.mrb[0].mxu1 %vm46_vm1, %v120_v34 }
 0x1be   :  { %v205_v39 = vpop.f32.mrb[0].mxu1 }
 0x1bf   :  { %v206_v40 = vadd.f32 %v322_v38, %v205_v39  ;;  %v386_v41 = vpop.f32.mrb[1].mxu1 }
 0x1c1   :  { %v209_v42 = vmax.f32 %v206_v40, 0.0 }
 0x1c3   :  { %396 = vmatmul.mubr.msk.f32.vlgmr.msra.gmra.mrb[2].mxu0 %vm221_vm2, %v209_v42 }
 0x296   :  { %v291_v47 = vpop.f32.mrb[2].mxu0 }
 0x297   :  { %v292_v48 = vadd.f32 %v324_v45, %v291_v47  ;;  %v397_v49 = vpop.f32.mrb[3].mxu0 }
 0x299   :  { %v298_v50 = vadd.f32 %v297_v46, %v292_v48 }
 0x29b   :  { %432 = vtanh.f32 %v298_v50 }
 0x2a5   :  { %v433_v53 = vpop.eup %432 }
 0x2a6   :  { %v303_v54 = vsel %vm301_vm3, %v433_v53, %v298_v50 }
 0x2a7   :  { %305 = vst.msk [vmem:[#allocation2] sm:$0xff] %vm304_vm4, %v303_v54 }
 0x2a8   :  { %445 = shalt.err (!%p442_p4)
}
 0x2a9   :  { %s446_s30 = scalar_lea.hbm %s607_s8, 128 }
 0x2aa   :  { %p447_p5 = scmp.ne.s32.totalorder %s607_s8, %s446_s30  ;;  %p450_p6 = scmp.lt.u32.totalorder %s446_s30, %s607_s8 }
 0x2ac   :  { %p452_p7 = pnand %p450_p6, %p447_p5 }
 0x2ae   :  { %455 = shalt.err (!%p452_p7)
}
 0x2af   :  { %315 = dma.vmem_to_hbm [thread:$0]  %s313_s6, 128, %s607_s8, [#allocation3]  }
 0x2b0   :  { %456 = dma.done.wait [#allocation3], 128  }
 0x2b1   :  { %457 = vsyncadd [#allocation3], 4294967168 }
 0x2b2   :  { %319 = vsyncpa [#allocation3], 1 }

</bundles_post_ra>
